<compile_context>
chip_gen: v5e
topology: v5e:2x2
jax: 0.10.0
libtpu: 0.0.40
codegen_flags: <defaults>
</compile_context>

<pallas_src>
import jax
import jax.numpy as jnp
from jax.experimental import pallas as pl
from jax.experimental.pallas import tpu as pltpu


# ----------------------------------------------------------------------------- kernel body
def _locscale_kernel(x_ref, w1_ref, b1_ref, w2_ref, b2_ref, o_ref):
    # x arrives f32; cast to the weight compute dtype (bf16) right before the MXU.
    xb = x_ref[...].astype(w1_ref.dtype)
    h = jnp.dot(xb, w1_ref[...], preferred_element_type=jnp.float32)
    h = jnp.maximum(h + b1_ref[...], 0.0)                      # bias + ReLU in f32 (VPU)
    o = jnp.dot(h.astype(w2_ref.dtype), w2_ref[...],
                preferred_element_type=jnp.float32)
    o_ref[...] = (o + b2_ref[...]).astype(o_ref.dtype)


# ----------------------------------------------------------------------------- hw queries
def _vmem_capacity_bytes() -> int:
    try:
        cap = int(pltpu.get_tpu_info().vmem_capacity_bytes)
        if cap > 0:
            return cap
    except Exception:
        pass
    return 64 * 1024 * 1024  # conservative: v7x per-TensorCore VMEM


def _num_tensorcores() -> int:
    # Best-effort detection of megacore (v7x: 2 TCs/chip). Falls back to 1 (v5e/v6e behavior).
    try:
        info = pltpu.get_tpu_info()
        for attr in ("num_cores", "core_count", "tensorcore_count", "num_tensorcores"):
            n = getattr(info, attr, None)
            if isinstance(n, int) and n > 0:
                return n
    except Exception:
        pass
    try:
        n = getattr(jax.devices()[0], "num_cores", None)
        if isinstance(n, int) and n > 0:
            return n
    except Exception:
        pass
    return 1


# ----------------------------------------------------------------------------- tile choice
def _pick_batch_tile(B, H, Op, in_bytes, out_bytes, cbytes, vmem_budget, want_multi_step):
    def footprint(tb):
        nsteps = pl.cdiv(B, tb)
        nbuf = 2 if nsteps > 1 else 1
        return (nbuf * tb * H * in_bytes            # pipelined f32 x tiles
                + nbuf * tb * Op * out_bytes        # pipelined output tiles
                + H * H * cbytes + H * Op * cbytes  # resident bf16 weights
                + (H + Op) * 4                      # f32 biases
                + tb * (H + Op) * 4                 # f32 h tile + second-dot accumulator
                + tb * H * cbytes)                  # in-kernel bf16 copy of x

    # Full batch first, then MXU-friendly tiles (all multiples of 8, fine for f32 sublanes).
    cands = [B] + [c for c in (512, 256, 128, 64, 32, 16, 8) if c < B]
    fitting = [c for c in cands if footprint(c) <= vmem_budget]
    if not fitting:
        fitting = [cands[-1]]  # weights dominate; take the smallest tile and let XLA cope
    if want_multi_step:
        # Prefer the largest tile that still yields >=2 grid steps (megacore split).
        multi = [c for c in fitting if pl.cdiv(B, c) >= 2]
        if multi:
            return multi[0]
    return fitting[0]


# ----------------------------------------------------------------------------- param prep
def prepare_locscale_params(w1, b1, w2, b2, compute_dtype=jnp.bfloat16, lane=128):
    """One-time parameter preparation (outside the per-call path): cast weights to the MXU
    compute dtype, reshape biases to (1, N) f32, and zero-pad the output dim to a lane-dense
    multiple of 128."""
    H = w1.shape[0]
    O = w2.shape[1]
    Op = pl.cdiv(O, lane) * lane
    if Op != O:
        w2 = jnp.pad(w2, ((0, 0), (0, Op - O)))
        b2 = jnp.pad(b2, ((0, Op - O),))
    return dict(
        w1=w1.astype(compute_dtype),
        b1=b1.reshape(1, H).astype(jnp.float32),
        w2=w2.astype(compute_dtype),
        b2=b2.reshape(1, Op).astype(jnp.float32),
        out_dim=O,
    )


# ----------------------------------------------------------------------------- entry point
def locscale_extractor(x, params, *, tb=None):
    """x: (B, H) f32/bf16; params from prepare_locscale_params. Returns (B, out_dim) in x.dtype."""
    w1, b1, w2, b2 = params["w1"], params["b1"], params["w2"], params["b2"]
    O = params["out_dim"]
    B, H = x.shape
    Op = w2.shape[1]
    out_dtype = x.dtype

    in_bytes = jnp.dtype(x.dtype).itemsize
    obytes = jnp.dtype(out_dtype).itemsize
    cbytes = jnp.dtype(w1.dtype).itemsize

    vmem_budget = int(0.85 * _vmem_capacity_bytes())

    if tb is None:
        tb = _pick_batch_tile(B, H, Op, in_bytes, obytes, cbytes, vmem_budget,
                              want_multi_step=_num_tensorcores() > 1)
    if tb != B:
        assert tb % 8 == 0, "partial batch tiles must be sublane-aligned (multiple of 8)"

    n_steps = pl.cdiv(B, tb)
    nbuf = 2 if n_steps > 1 else 1

    # Corrected VMEM footprint (f32 intermediates + in-kernel bf16 x copy included).
    vmem_bytes = (nbuf * tb * H * in_bytes + nbuf * tb * Op * obytes
                  + H * H * cbytes + H * Op * cbytes + (H + Op) * 4
                  + tb * (H + Op) * 4 + tb * H * cbytes)

    cp_kwargs = dict(dimension_semantics=("parallel",))
    if vmem_bytes > 30 * 1024 * 1024:
        cp_kwargs["vmem_limit_bytes"] = min(int(vmem_bytes * 3 // 2), vmem_budget)

    cost = pl.CostEstimate(
        flops=2 * B * H * (H + Op),
        transcendentals=0,
        bytes_accessed=(B * H * in_bytes + H * H * cbytes + H * Op * cbytes
                        + (H + Op) * 4 + B * Op * obytes),
    )

    resident = pl.Buffered(1)  # grid-invariant blocks: never double-buffer
    if n_steps == 1:
        # Nothing to pipeline: single-buffer x and out too (halves their VMEM footprint).
        x_spec = pl.BlockSpec((tb, H), lambda i: (i, 0), pipeline_mode=pl.Buffered(1))
        o_spec = pl.BlockSpec((tb, Op), lambda i: (i, 0), pipeline_mode=pl.Buffered(1))
    else:
        x_spec = pl.BlockSpec((tb, H), lambda i: (i, 0))
        o_spec = pl.BlockSpec((tb, Op), lambda i: (i, 0))

    out = pl.pallas_call(
        _locscale_kernel,
        out_shape=jax.ShapeDtypeStruct((B, Op), out_dtype),
        grid_spec=pltpu.PrefetchScalarGridSpec(
            num_scalar_prefetch=0,
            grid=(n_steps,),
            in_specs=[
                x_spec,                                                           # x tile (f32)
                pl.BlockSpec((H, H), lambda i: (0, 0), pipeline_mode=resident),   # w1 resident
                pl.BlockSpec((1, H), lambda i: (0, 0), pipeline_mode=resident),   # b1
                pl.BlockSpec((H, Op), lambda i: (0, 0), pipeline_mode=resident),  # w2 resident
                pl.BlockSpec((1, Op), lambda i: (0, 0), pipeline_mode=resident),  # b2
            ],
            out_specs=o_spec,
        ),
        compiler_params=pltpu.CompilerParams(**cp_kwargs),
        cost_estimate=cost,
    )(x, w1, b1, w2, b2)

    if Op != O:
        out = out[:, :O]
    return out

# TODO(synk): the learn_scale=True branch (single Linear(hidden, locscale_dim*output_mult))
# is not implemented; only the default MLP path is translated.
# TODO(synk): for very large hidden (H >= ~4096 bf16 on v7x) the fully-resident-weight
# strategy should switch to a K-tiled reduction (trailing "arbitrary" grid axis + f32
# accumulator scratch); not needed at the module's actual sizes.


# ----------------------------------------------------------------------------- references
def locscale_ref_f32(x, w1, b1, w2, b2):
    h = jnp.maximum(jnp.dot(x, w1) + b1, 0.0)
    return jnp.dot(h, w2) + b2


def locscale_ref_bf16(x, w1, b1, w2, b2, compute_dtype=jnp.bfloat16):
    xc, w1c, w2c = (t.astype(compute_dtype) for t in (x, w1, w2))
    h = jnp.maximum(jnp.dot(xc, w1c, preferred_element_type=jnp.float32) + b1, 0.0)
    o = jnp.dot(h.astype(compute_dtype), w2c, preferred_element_type=jnp.float32) + b2
    return o.astype(x.dtype)


if __name__ == "__main__":
    # Module hyper-params (small, TPU-tile-friendly).
    hidden_size = 128
    num_patches = 8
    locscale_dim = 8
    stochastic = False
    output_mult = 2 if stochastic is not None else 1      # mirrors the PyTorch expression (== 2)
    out_dim = locscale_dim * num_patches * output_mult     # 128

    batch = 64

    key = jax.random.PRNGKey(0)
    kx, kw1, kw2 = jax.random.split(key, 3)

    # init_weights(..., normal_(std=0.08)) on the Linear weights; biases zero.
    x = jax.random.normal(kx, (batch, hidden_size), dtype=jnp.float32)
    w1 = 0.08 * jax.random.normal(kw1, (hidden_size, hidden_size), dtype=jnp.float32)
    b1 = jnp.zeros((hidden_size,), dtype=jnp.float32)
    w2 = 0.08 * jax.random.normal(kw2, (hidden_size, out_dim), dtype=jnp.float32)
    b2 = jnp.zeros((out_dim,), dtype=jnp.float32)

    params = prepare_locscale_params(w1, b1, w2, b2)       # one-time weight prep (bf16, padded)

    out = locscale_extractor(x, params)
    out = jax.block_until_ready(out)
    assert out.shape == (batch, out_dim)

    ref_q = locscale_ref_bf16(x, w1, b1, w2, b2)            # matches kernel quantization
    ref_f = locscale_ref_f32(x, w1, b1, w2, b2)             # pure f32 module semantics
    assert jnp.allclose(out, ref_q, atol=2e-2, rtol=2e-2), "mismatch vs bf16-matched reference"
    assert jnp.allclose(out, ref_f, atol=5e-2, rtol=5e-2), "mismatch vs f32 reference"

    print("KERNEL_OK")
</pallas_src>

<mosaic_0001>
module attributes {stable_mosaic.version = 11 : i64} {
  func.func @_locscale_kernel(%arg0: i32, %arg1: memref<64x128xf32, #tpu.memory_space<vmem>>, %arg2: memref<128x128xbf16, #tpu.memory_space<vmem>>, %arg3: memref<1x128xf32, #tpu.memory_space<vmem>>, %arg4: memref<128x128xbf16, #tpu.memory_space<vmem>>, %arg5: memref<1x128xf32, #tpu.memory_space<vmem>>, %arg6: memref<64x128xf32, #tpu.memory_space<vmem>>) attributes {dimension_semantics = [#tpu.dimension_semantics<parallel>], iteration_bounds = array<i64: 1>, scalar_prefetch = 0 : i64, scratch_operands = 0 : i64, tpu.core_type = #tpu.core_type<tc>, window_params = [{pipeline_mode = #tpu.pipeline_mode<synchronous>, transform_indices = @transform_0, window_bounds = array<i64: 64, 128>}, {pipeline_mode = #tpu.pipeline_mode<synchronous>, transform_indices = @transform_1, window_bounds = array<i64: 128, 128>}, {pipeline_mode = #tpu.pipeline_mode<synchronous>, transform_indices = @transform_2, window_bounds = array<i64: 1, 128>}, {pipeline_mode = #tpu.pipeline_mode<synchronous>, transform_indices = @transform_3, window_bounds = array<i64: 128, 128>}, {pipeline_mode = #tpu.pipeline_mode<synchronous>, transform_indices = @transform_4, window_bounds = array<i64: 1, 128>}, {pipeline_mode = #tpu.pipeline_mode<synchronous>, transform_indices = @transform_5, window_bounds = array<i64: 64, 128>}]} {
    %c0 = arith.constant 0 : index
    %c0_0 = arith.constant 0 : index
    %0 = vector.load %arg1[%c0, %c0_0] : memref<64x128xf32, #tpu.memory_space<vmem>>, vector<64x128xf32>
    %1 = arith.truncf %0 : vector<64x128xf32> to vector<64x128xbf16>
    %c0_1 = arith.constant 0 : index
    %c0_2 = arith.constant 0 : index
    %2 = vector.load %arg2[%c0_1, %c0_2] : memref<128x128xbf16, #tpu.memory_space<vmem>>, vector<128x128xbf16>
    %cst = arith.constant dense<0.000000e+00> : vector<64x128xf32>
    %3 = tpu.matmul %1, %2, %cst {dimension_numbers = #tpu.dot_dimension_numbers<[1], [0], [0], [1], [0, 0, 1, 1], [], []>} : vector<64x128xbf16>, vector<128x128xbf16>, vector<64x128xf32> -> vector<64x128xf32>
    %c0_3 = arith.constant 0 : index
    %c0_4 = arith.constant 0 : index
    %4 = vector.load %arg3[%c0_3, %c0_4] : memref<1x128xf32, #tpu.memory_space<vmem>>, vector<1x128xf32>
    %5 = vector.broadcast %4 : vector<1x128xf32> to vector<64x128xf32>
    %6 = arith.addf %3, %5 : vector<64x128xf32>
    %cst_5 = arith.constant 0.000000e+00 : f32
    %7 = vector.broadcast %cst_5 : f32 to vector<64x128xf32>
    %8 = arith.maximumf %6, %7 : vector<64x128xf32>
    %9 = arith.truncf %8 : vector<64x128xf32> to vector<64x128xbf16>
    %c0_6 = arith.constant 0 : index
    %c0_7 = arith.constant 0 : index
    %10 = vector.load %arg4[%c0_6, %c0_7] : memref<128x128xbf16, #tpu.memory_space<vmem>>, vector<128x128xbf16>
    %cst_8 = arith.constant dense<0.000000e+00> : vector<64x128xf32>
    %11 = tpu.matmul %9, %10, %cst_8 {dimension_numbers = #tpu.dot_dimension_numbers<[1], [0], [0], [1], [0, 0, 1, 1], [], []>} : vector<64x128xbf16>, vector<128x128xbf16>, vector<64x128xf32> -> vector<64x128xf32>
    %c0_9 = arith.constant 0 : index
    %c0_10 = arith.constant 0 : index
    %12 = vector.load %arg5[%c0_9, %c0_10] : memref<1x128xf32, #tpu.memory_space<vmem>>, vector<1x128xf32>
    %13 = vector.broadcast %12 : vector<1x128xf32> to vector<64x128xf32>
    %14 = arith.addf %11, %13 : vector<64x128xf32>
    %c0_11 = arith.constant 0 : index
    %c0_12 = arith.constant 0 : index
    %15 = vector.load %arg6[%c0_11, %c0_12] : memref<64x128xf32, #tpu.memory_space<vmem>>, vector<64x128xf32>
    tpu.vector_store %arg6[%c0_11, %c0_12], %14 {strides = array<i32>} : memref<64x128xf32, #tpu.memory_space<vmem>>, vector<64x128xf32>,
    return
  }
  func.func @transform_0(%arg0: i32) -> (i32, i32) {
    %c0_i32 = arith.constant 0 : i32
    %c0_i32_0 = arith.constant 0 : i32
    return %arg0, %c0_i32 : i32, i32
  }
  func.func @transform_1(%arg0: i32) -> (i32, i32) {
    %c0_i32 = arith.constant 0 : i32
    %c0_i32_0 = arith.constant 0 : i32
    %c0_i32_1 = arith.constant 0 : i32
    return %c0_i32, %c0_i32_0 : i32, i32
  }
  func.func @transform_2(%arg0: i32) -> (i32, i32) {
    %c0_i32 = arith.constant 0 : i32
    %c0_i32_0 = arith.constant 0 : i32
    %c0_i32_1 = arith.constant 0 : i32
    return %c0_i32, %c0_i32_0 : i32, i32
  }
  func.func @transform_3(%arg0: i32) -> (i32, i32) {
    %c0_i32 = arith.constant 0 : i32
    %c0_i32_0 = arith.constant 0 : i32
    %c0_i32_1 = arith.constant 0 : i32
    return %c0_i32, %c0_i32_0 : i32, i32
  }
  func.func @transform_4(%arg0: i32) -> (i32, i32) {
    %c0_i32 = arith.constant 0 : i32
    %c0_i32_0 = arith.constant 0 : i32
    %c0_i32_1 = arith.constant 0 : i32
    return %c0_i32, %c0_i32_0 : i32, i32
  }
  func.func @transform_5(%arg0: i32) -> (i32, i32) {
    %c0_i32 = arith.constant 0 : i32
    %c0_i32_0 = arith.constant 0 : i32
    return %arg0, %c0_i32 : i32, i32
  }
}

</mosaic_0001>

<bundles_post_ra>
// kernel: tpu_custom_call.1
= control target key start
LH: loop header
LB: loop body
LE: loop exit
PB: predicated region body
PF: predicated region fallthrough
CT: control target
= control target key end

     0   :  { %10 = vsyncpa [#allocation3], 0  ;;  %s584_s0 = inlined_call_operand.hbm [shape: f32[64,128], index: 0, kind: input, shape index: {}]   ;;  %s585_s1 = inlined_call_operand.hbm [shape: bf16[128,128], index: 1, kind: input, shape index: {}]   ;;  %s586_s2 = inlined_call_operand.vmem [shape: f32[1,128], index: 2, kind: input, shape index: {}]   ;;  %s587_s3 = inlined_call_operand.hbm [shape: bf16[128,128], index: 3, kind: input, shape index: {}]   ;;  %s588_s4 = inlined_call_operand.vmem [shape: f32[1,128], index: 4, kind: input, shape index: {}]   ;;  %s589_s5 = inlined_call_operand.hbm [shape: f32[64,128], index: 5, kind: output, shape index: {}]  }
   0x1   :  { %11 = vsyncpa [#allocation6], 0  ;;  %s30_s20 = sshll.u32 %s585_s1, 4  ;;  %s31_s20 = int_to_ptr.hbm [resolvable:$true] %s30_s20 }
   0x2   :  { %12 = vsyncpa [#allocation4], 0  ;;  %s522_s21 = smov [#allocation5]   ;;  %s17_s25 = sshll.u32 %s584_s0, 4  ;;  %s18_s25 = int_to_ptr.hbm [resolvable:$true] %s17_s25 }
   0x3   :  { %s32_s22 = sshll.u32 %s522_s21, 4  ;;  %s523_s26 = smov 64   ;;  %s33_s22 = int_to_ptr.vmem [resolvable:$true] %s32_s22 }
   0x4   :  { %s524_s27 = smov 4   ;;  %s525_s28 = smov [#allocation2]  }
   0x5   :  { %38 = dma.hbm_to_vmem [thread:$0]  %s31_s20, 1024, %s33_s22, [#allocation6], %s523_s26, %s523_s26, %s524_s27  }
   0x6   :  { %s19_s29 = sshll.u32 %s525_s28, 4  ;;  %s526_s30 = smov 128   ;;  %s20_s29 = int_to_ptr.vmem [resolvable:$true] %s19_s29 }
   0x7   :  { %s527_s6 = smov 8   ;;  %s45_s8 = sshll.u32 %s587_s3, 4  ;;  %s46_s8 = int_to_ptr.hbm [resolvable:$true] %s45_s8 }
   0x8   :  { %25 = dma.hbm_to_vmem [thread:$0]  %s18_s25, 1024, %s20_s29, [#allocation3], %s526_s30, %s526_s30, %s527_s6  }
   0x9   :  { %s528_s9 = smov [#allocation7]  }
   0xa   :  { %s47_s0 = sshll.u32 %s528_s9, 4  ;;  %s48_s0 = int_to_ptr.vmem [resolvable:$true] %s47_s0 }
   0xb   :  { %53 = dma.hbm_to_vmem [thread:$0]  %s46_s8, 1024, %s48_s0, [#allocation6], %s523_s26, %s523_s26, %s524_s27  }
   0xc   :  { %516 = dma.done.wait [#allocation3], 1024  }
   0xd   :  { %517 = vsyncadd [#allocation3], 4294966272 }
   0xe   :  { %518 = dma.done.wait [#allocation6], 2048  }
   0xf   :  { %519 = vsyncadd [#allocation6], 4294965248  ;;  %v385_v0 = vld [vmem:[#allocation5 + $0x38] sm:$0xff]  ;;  %v384_v1 = vld [vmem:[#allocation5 + $0x30] sm:$0xff]  ;;  %s300_s15 = sshll.u32 %s589_s5, 4  ;;  %s301_s15 = int_to_ptr.hbm [resolvable:$true] %s300_s15 }
  0x10   :  { %148 = vmatpush.bf16.msra.mxu0 %v385_v0  ;;  %394 = vmatpush.bf16.msra.mxu2 %v385_v0  ;;  %v383_v2 = vld [vmem:[#allocation5 + $0x28] sm:$0xff]  ;;  %v382_v3 = vld [vmem:[#allocation5 + $0x20] sm:$0xff]  ;;  %v381_v4 = vld [vmem:[#allocation5 + $0x18] sm:$0xff] }
  0x11   :  { %v393_v5 = vld [vmem:[#allocation7 + $0x38] sm:$0xff]  ;;  %v380_v6 = vld [vmem:[#allocation5 + $0x10] sm:$0xff]  ;;  %v379_v8 = vld [vmem:[#allocation5 + $0x8] sm:$0xff] }
  0x12   :  { %257 = vmatpush.bf16.msra.mxu1 %v393_v5  ;;  %v392_v7 = vld [vmem:[#allocation7 + $0x30] sm:$0xff]  ;;  %402 = vmatpush.bf16.msra.mxu3 %v393_v5  ;;  %v391_v9 = vld [vmem:[#allocation7 + $0x28] sm:$0xff]  ;;  %v378_v10 = vld [vmem:[#allocation5] sm:$0xff] }
  0x13   :  { %v68_v11 = vld [vmem:[#allocation2] sm:$0xff]  ;;  %v69_v12 = vld [vmem:[#allocation2 + $0x8] sm:$0xff]  ;;  %v70_v18 = vld [vmem:[#allocation2 + $0x10] sm:$0xff] }
  0x14   :  { %149 = vmatpush.bf16.msra.mxu0 %v384_v1  ;;  %395 = vmatpush.bf16.msra.mxu2 %v384_v1  ;;  %v72_v13 = vld [vmem:[#allocation2 + $0x20] sm:$0xff]  ;;  %v73_v14 = vld [vmem:[#allocation2 + $0x28] sm:$0xff]  ;;  %v76_v16 = vpack.c.bf16 %v69_v12, %v68_v11  ;;  %v71_v19 = vld [vmem:[#allocation2 + $0x18] sm:$0xff] }
  0x15   :  { %v390_v15 = vld [vmem:[#allocation7 + $0x20] sm:$0xff]  ;;  %v78_v17 = vpack.c.bf16 %v73_v14, %v72_v13  ;;  %v74_v20 = vld [vmem:[#allocation2 + $0x30] sm:$0xff]  ;;  %v75_v21 = vld [vmem:[#allocation2 + $0x38] sm:$0xff]  ;;  %v77_v22 = vpack.c.bf16 %v71_v19, %v70_v18 }
  0x16   :  { %258 = vmatpush.bf16.msra.mxu1 %v392_v7  ;;  %403 = vmatpush.bf16.msra.mxu3 %v392_v7  ;;  %v79_v23 = vpack.c.bf16 %v75_v21, %v74_v20  ;;  %v389_v24 = vld [vmem:[#allocation7 + $0x18] sm:$0xff]  ;;  %v388_v25 = vld [vmem:[#allocation7 + $0x10] sm:$0xff]  ;;  %v387_v26 = vld [vmem:[#allocation7 + $0x8] sm:$0xff] }
  0x17   :  { %v386_v27 = vld [vmem:[#allocation7] sm:$0xff] }
  0x18   :  { %150 = vmatpush.bf16.msra.mxu0 %v383_v2  ;;  %396 = vmatpush.bf16.msra.mxu2 %v383_v2  ;;  %v418_v29 = vld [vmem:[%s586_s2] ss:$0 sm:$0xff] }
  0x19   :  { %v419_v57 = vld [vmem:[%s588_s4] ss:$0 sm:$0xff]  ;;  %s529_s4 = smov [#allocation8]  }
  0x1a   :  { %259 = vmatpush.bf16.msra.mxu1 %v391_v9  ;;  %404 = vmatpush.bf16.msra.mxu3 %v391_v9  ;;  %s298_s12 = sshll.u32 %s529_s4, 4  ;;  %s299_s12 = int_to_ptr.vmem [resolvable:$true] %s298_s12 }
  0x1c   :  { %151 = vmatpush.bf16.msra.mxu0 %v382_v3  ;;  %397 = vmatpush.bf16.msra.mxu2 %v382_v3 }
  0x1e   :  { %260 = vmatpush.bf16.msra.mxu1 %v390_v15  ;;  %405 = vmatpush.bf16.msra.mxu3 %v390_v15 }
  0x20   :  { %152 = vmatpush.bf16.msra.mxu0 %v381_v4  ;;  %398 = vmatpush.bf16.msra.mxu2 %v381_v4 }
  0x22   :  { %261 = vmatpush.bf16.msra.mxu1 %v389_v24  ;;  %406 = vmatpush.bf16.msra.mxu3 %v389_v24 }
  0x24   :  { %153 = vmatpush.bf16.msra.mxu0 %v380_v6  ;;  %399 = vmatpush.bf16.msra.mxu2 %v380_v6 }
  0x26   :  { %262 = vmatpush.bf16.msra.mxu1 %v388_v25  ;;  %407 = vmatpush.bf16.msra.mxu3 %v388_v25 }
  0x28   :  { %154 = vmatpush.bf16.msra.mxu0 %v379_v8  ;;  %400 = vmatpush.bf16.msra.mxu2 %v379_v8 }
  0x2a   :  { %263 = vmatpush.bf16.msra.mxu1 %v387_v26  ;;  %408 = vmatpush.bf16.msra.mxu3 %v387_v26 }
  0x2c   :  { %155 = vmatpush.bf16.msra.mxu0 %v378_v10  ;;  %401 = vmatpush.bf16.msra.mxu2 %v378_v10 }
  0x2e   :  { %264 = vmatpush.bf16.msra.mxu1 %v386_v27  ;;  %409 = vmatpush.bf16.msra.mxu3 %v386_v27 }
  0x2f   :  { %156 = vmatmul.bf16.vlgmr.msra.gmra.mxu0 %v76_v16  ;;  %166 = vmatmul.bf16.vlgmr.msra.gmra.mxu2 %v78_v17 }
  0x3f   :  { %161 = vmatmul.bf16.gmra.mxu0 %v77_v22  ;;  %171 = vmatmul.bf16.gmra.mxu2 %v79_v23 }
  0xac   :  { %v157_v28 = vpop.f32.mrf.mxu0 }
  0xad   :  { %v158_v30 = vadd.f32 %v418_v29, %v157_v28 }
  0xaf   :  { %v177_v33 = vmax.f32 %v158_v30, 0.0 }
  0xb2   :  { %v167_v31 = vpop.f32.mrf.mxu2 }
  0xb3   :  { %v168_v36 = vadd.f32 %v418_v29, %v167_v31 }
  0xb4   :  { %v159_v32 = vpop.f32.mrf.mxu0 }
  0xb5   :  { %v160_v34 = vadd.f32 %v418_v29, %v159_v32  ;;  %v181_v41 = vmax.f32 %v168_v36, 0.0 }
  0xb7   :  { %v178_v35 = vmax.f32 %v160_v34, 0.0 }
  0xb9   :  { %v185_v37 = vpack.c.bf16 %v178_v35, %v177_v33 }
  0xba   :  { %v169_v38 = vpop.f32.mrf.mxu2 }
  0xbb   :  { %v170_v39 = vadd.f32 %v418_v29, %v169_v38  ;;  %265 = vmatmul.bf16.vlgmr.msra.gmra.mxu1 %v185_v37 }
  0xbc   :  { %v162_v40 = vpop.f32.mrf.mxu0 }
  0xbd   :  { %v182_v42 = vmax.f32 %v170_v39, 0.0  ;;  %v163_v44 = vadd.f32 %v418_v29, %v162_v40 }
  0xbf   :  { %v187_v43 = vpack.c.bf16 %v182_v42, %v181_v41  ;;  %v179_v47 = vmax.f32 %v163_v44, 0.0 }
  0xc1   :  { %275 = vmatmul.bf16.vlgmr.msra.gmra.mxu3 %v187_v43 }
  0xc2   :  { %v172_v45 = vpop.f32.mrf.mxu2 }
  0xc3   :  { %v173_v50 = vadd.f32 %v418_v29, %v172_v45 }
  0xc4   :  { %v164_v46 = vpop.f32.mrf.mxu0 }
  0xc5   :  { %v165_v48 = vadd.f32 %v418_v29, %v164_v46  ;;  %v183_v54 = vmax.f32 %v173_v50, 0.0 }
  0xc7   :  { %v180_v49 = vmax.f32 %v165_v48, 0.0 }
  0xc9   :  { %v186_v51 = vpack.c.bf16 %v180_v49, %v179_v47 }
  0xca   :  { %v174_v52 = vpop.f32.mrf.mxu2 }
  0xcb   :  { %v175_v53 = vadd.f32 %v418_v29, %v174_v52  ;;  %270 = vmatmul.bf16.gmra.mxu1 %v186_v51 }
  0xcd   :  { %v184_v55 = vmax.f32 %v175_v53, 0.0 }
  0xcf   :  { %v188_v56 = vpack.c.bf16 %v184_v55, %v183_v54 }
  0xd1   :  { %280 = vmatmul.bf16.gmra.mxu3 %v188_v56 }
 0x138   :  { %v266_v58 = vpop.f32.mrf.mxu1 }
 0x139   :  { %v267_v59 = vadd.f32 %v419_v57, %v266_v58 }
 0x13b   :  { %286 = vst [vmem:[#allocation8] sm:$0xff] %v267_v59 }
 0x140   :  { %v268_v60 = vpop.f32.mrf.mxu1 }
 0x141   :  { %v269_v61 = vadd.f32 %v419_v57, %v268_v60 }
 0x143   :  { %287 = vst [vmem:[#allocation8 + $0x8] sm:$0xff] %v269_v61 }
 0x144   :  { %v276_v62 = vpop.f32.mrf.mxu3 }
 0x145   :  { %v277_v63 = vadd.f32 %v419_v57, %v276_v62 }
 0x147   :  { %290 = vst [vmem:[#allocation8 + $0x20] sm:$0xff] %v277_v63 }
 0x148   :  { %v271_v0 = vpop.f32.mrf.mxu1 }
 0x149   :  { %v272_v1 = vadd.f32 %v419_v57, %v271_v0 }
 0x14b   :  { %288 = vst [vmem:[#allocation8 + $0x10] sm:$0xff] %v272_v1 }
 0x14c   :  { %v278_v2 = vpop.f32.mrf.mxu3 }
 0x14d   :  { %v279_v3 = vadd.f32 %v419_v57, %v278_v2 }
 0x14f   :  { %291 = vst [vmem:[#allocation8 + $0x28] sm:$0xff] %v279_v3 }
 0x150   :  { %v273_v4 = vpop.f32.mrf.mxu1 }
 0x151   :  { %v274_v5 = vadd.f32 %v419_v57, %v273_v4 }
 0x153   :  { %289 = vst [vmem:[#allocation8 + $0x18] sm:$0xff] %v274_v5 }
 0x154   :  { %v281_v6 = vpop.f32.mrf.mxu3 }
 0x155   :  { %v282_v7 = vadd.f32 %v419_v57, %v281_v6 }
 0x157   :  { %292 = vst [vmem:[#allocation8 + $0x30] sm:$0xff] %v282_v7 }
 0x15c   :  { %v283_v8 = vpop.f32.mrf.mxu3 }
 0x15d   :  { %v284_v9 = vadd.f32 %v419_v57, %v283_v8 }
 0x15f   :  { %293 = vst [vmem:[#allocation8 + $0x38] sm:$0xff] %v284_v9 }
 0x160   :  { %306 = dma.vmem_to_hbm [thread:$0]  %s299_s12, 1024, %s301_s15, [#allocation4], %s526_s30, %s526_s30, %s527_s6  }
 0x161   :  { %520 = dma.done.wait [#allocation4], 1024  }
 0x162   :  { %521 = vsyncadd [#allocation4], 4294966272 }
 0x163   :  { %311 = vsyncpa [#allocation3], 1 }
 0x164   :  { %312 = vsyncpa [#allocation6], 1 }
 0x165   :  { %313 = vsyncpa [#allocation4], 1 }

</bundles_post_ra>
